<compile_context>
chip_gen: v7x
topology: tpu7x:2x2x1
jax: 0.10.0
libtpu: 0.0.40
codegen_flags: <defaults>
</compile_context>

<pallas_src>
import math
import jax
import jax.numpy as jnp
from jax.experimental import pallas as pl
from jax.experimental.pallas import tpu as pltpu


def _leaky_relu(x, slope=0.01):
    # max form: one vmul + one vmax (vs compare + select + mul)
    return jnp.maximum(x, slope * x)


def _round_up(x, m):
    return ((x + m - 1) // m) * m


def actor_kernel(x_ref,
                 w1_ref, b1_ref,
                 w2_ref, b2_ref,
                 w3_ref, b3_ref,
                 wmu_ref, bmu_ref,
                 out_ref):
    # fc1 -> leaky_relu   (all weight N-dims pre-padded to 128 -> lane-dense)
    x = x_ref[...].astype(jnp.bfloat16)
    h = jnp.dot(x, w1_ref[...], preferred_element_type=jnp.float32) + b1_ref[...]
    h = _leaky_relu(h)
    # fc2 -> leaky_relu
    h = jnp.dot(h.astype(jnp.bfloat16), w2_ref[...],
                preferred_element_type=jnp.float32) + b2_ref[...]
    h = _leaky_relu(h)
    # fc3 -> leaky_relu
    h = jnp.dot(h.astype(jnp.bfloat16), w3_ref[...],
                preferred_element_type=jnp.float32) + b3_ref[...]
    h = _leaky_relu(h)
    # mu -> tanh  (output feature dim pre-padded to a lane-dense 128 slab)
    mu = jnp.dot(h.astype(jnp.bfloat16), wmu_ref[...],
                 preferred_element_type=jnp.float32) + bmu_ref[...]
    out_ref[...] = jnp.tanh(mu).astype(out_ref.dtype)


def actor_forward(state, params, *, tb=1024):
    """state: (B, obs) f32 or bf16.  Returns (B, act_dim) f32 actions."""
    B, obs = state.shape
    w1, b1 = params["w1"], params["b1"]
    w2, b2 = params["w2"], params["b2"]
    w3, b3 = params["w3"], params["b3"]
    wmu, bmu = params["wmu"], params["bmu"]
    act_dim = params["act_dim"]

    fc1_p = w1.shape[1]              # padded hidden / output widths (>=128)
    fc2_p = w2.shape[1]
    fc3_p = w3.shape[1]
    out_p = wmu.shape[1]

    # ---- batch tiling ------------------------------------------------------
    G = 16                           # granularity (bf16 sublane pack = 16)
    B_ceil = _round_up(B, G)
    if B_ceil >= 2 * G:
        # ensure >= 2 grid steps so the 'parallel' axis can shard across the
        # two TensorCores on v7x, while keeping tiles as large as allowed.
        half = _round_up((B_ceil + 1) // 2, G)
        TB = min(_round_up(min(tb, B_ceil), G), half) if tb >= G else G
        TB = max(TB, G)
    else:
        TB = B_ceil
    B_pad = _round_up(B_ceil, TB)
    if B_pad != B:
        state = jnp.pad(state, ((0, B_pad - B), (0, 0)))
    grid = (B_pad // TB,)

    def batch_map(i):
        return (i, 0)

    def resident_map(i):
        return (0, 0)

    weight_args = (w1, b1, w2, b2, w3, b3, wmu, bmu)
    weight_specs = [pl.BlockSpec(w.shape, resident_map) for w in weight_args]

    flops = 2 * B_pad * (obs * fc1_p + fc1_p * fc2_p + fc2_p * fc3_p
                         + fc3_p * out_p)
    transcendentals = B_pad * out_p                       # tanh
    bytes_accessed = (int(state.size) * state.dtype.itemsize
                      + sum(int(w.size) * w.dtype.itemsize for w in weight_args)
                      + B_pad * out_p * 2)                # bf16 output slab
    cost = pl.CostEstimate(flops=flops,
                           transcendentals=transcendentals,
                           bytes_accessed=bytes_accessed)

    out_padded = pl.pallas_call(
        actor_kernel,
        out_shape=jax.ShapeDtypeStruct((B_pad, out_p), jnp.bfloat16),
        grid=grid,
        in_specs=[pl.BlockSpec((TB, obs), batch_map)] + weight_specs,
        out_specs=pl.BlockSpec((TB, out_p), batch_map),
        compiler_params=pltpu.CompilerParams(
            dimension_semantics=("parallel",),
            vmem_limit_bytes=32 * 1024 * 1024),
        cost_estimate=cost,
    )(state, *weight_args)

    # slice away the batch/lane padding; return f32 actions for downstream use
    return out_padded[:B, :act_dim].astype(jnp.float32)


def _xavier_uniform(key, fan_in, fan_out, gain):
    bound = gain * math.sqrt(6.0 / (fan_in + fan_out))
    # returned already transposed to (in, out) so kernel does y = x @ W + b
    return jax.random.uniform(key, (fan_in, fan_out), jnp.float32,
                              minval=-bound, maxval=bound)


def _linear_bias(key, fan_in, fan_out):
    # PyTorch nn.Linear default bias init: U(-1/sqrt(fan_in), 1/sqrt(fan_in))
    bound = 1.0 / math.sqrt(fan_in)
    return jax.random.uniform(key, (1, fan_out), jnp.float32,
                              minval=-bound, maxval=bound)


def _pad_layer(w, b, in_p, out_p):
    """Zero-pad a (in, out) weight and (1, out) bias to (in_p, out_p)/(1, out_p).

    CORRECTNESS INVARIANT: the padded weight rows/columns and bias entries
    MUST be zero.  Zeros propagate exactly through bias-add, leaky_relu(0)=0
    and tanh(0)=0, so padded lanes never contaminate real outputs.  Do not
    change the bias init of padded entries.
    """
    fi, fo = w.shape
    w = jnp.pad(w, ((0, in_p - fi), (0, out_p - fo)))
    b = jnp.pad(b, ((0, 0), (0, out_p - fo)))
    return w, b


def init_params(key, obs_dim, act_dim, fc1_dims, fc2_dims, fc3_dims):
    gain_lrelu = math.sqrt(2.0 / (1.0 + 0.01 ** 2))   # calculate_gain('leaky_relu')
    gain_tanh = 5.0 / 3.0                             # calculate_gain('tanh')
    ks = jax.random.split(key, 8)

    # lane-dense padded widths (>= 128) for every layer output
    fc1_p = _round_up(max(fc1_dims, 1), 128)
    fc2_p = _round_up(max(fc2_dims, 1), 128)
    fc3_p = _round_up(max(fc3_dims, 1), 128)
    out_p = _round_up(max(act_dim, 1), 128)

    w1 = _xavier_uniform(ks[0], obs_dim, fc1_dims, gain_lrelu)
    b1 = _linear_bias(ks[1], obs_dim, fc1_dims)
    w2 = _xavier_uniform(ks[2], fc1_dims, fc2_dims, gain_lrelu)
    b2 = _linear_bias(ks[3], fc1_dims, fc2_dims)
    w3 = _xavier_uniform(ks[4], fc2_dims, fc3_dims, gain_lrelu)
    b3 = _linear_bias(ks[5], fc2_dims, fc3_dims)
    wmu = _xavier_uniform(ks[6], fc3_dims, act_dim, gain_tanh)
    bmu = _linear_bias(ks[7], fc3_dims, act_dim)

    # Pad once at init (zero rows/cols) so every kernel dot is lane-dense.
    w1, b1 = _pad_layer(w1, b1, obs_dim, fc1_p)      # K stays at obs_dim
    w2, b2 = _pad_layer(w2, b2, fc1_p, fc2_p)
    w3, b3 = _pad_layer(w3, b3, fc2_p, fc3_p)
    wmu, bmu = _pad_layer(wmu, bmu, fc3_p, out_p)

    params = {
        # weights in bf16 (MXU-native on v6e/v7x, half the DMA bytes);
        # biases stay f32 (elementwise path stays f32 everywhere -> v5e-safe).
        "w1": w1.astype(jnp.bfloat16), "b1": b1,
        "w2": w2.astype(jnp.bfloat16), "b2": b2,
        "w3": w3.astype(jnp.bfloat16), "b3": b3,
        "wmu": wmu.astype(jnp.bfloat16), "bmu": bmu,
        "act_dim": act_dim,
    }
    return params


if __name__ == "__main__":
    B, OBS, ACT = 8, 16, 4
    FC1, FC2, FC3 = 64, 64, 32

    key = jax.random.PRNGKey(0)
    k_state, k_params = jax.random.split(key, 2)

    state = jax.random.normal(k_state, (B, OBS), jnp.float32)
    params = init_params(k_params, OBS, ACT, FC1, FC2, FC3)

    mu = actor_forward(state, params)
    jax.block_until_ready(mu)

    assert mu.shape == (B, ACT) and mu.dtype == jnp.float32
    assert bool(jnp.all(jnp.abs(mu) <= 1.0))   # tanh-bounded actions
    print("KERNEL_OK")
</pallas_src>

<mosaic_0001>
module attributes {stable_mosaic.version = 11 : i64} {
  func.func @actor_kernel(%arg0: i32, %arg1: memref<16x16xf32, #tpu.memory_space<vmem>>, %arg2: memref<16x128xbf16, #tpu.memory_space<vmem>>, %arg3: memref<1x128xf32, #tpu.memory_space<vmem>>, %arg4: memref<128x128xbf16, #tpu.memory_space<vmem>>, %arg5: memref<1x128xf32, #tpu.memory_space<vmem>>, %arg6: memref<128x128xbf16, #tpu.memory_space<vmem>>, %arg7: memref<1x128xf32, #tpu.memory_space<vmem>>, %arg8: memref<128x128xbf16, #tpu.memory_space<vmem>>, %arg9: memref<1x128xf32, #tpu.memory_space<vmem>>, %arg10: memref<16x128xbf16, #tpu.memory_space<vmem>>) attributes {dimension_semantics = [#tpu.dimension_semantics<parallel>], iteration_bounds = array<i64: 1>, scalar_prefetch = 0 : i64, scratch_operands = 0 : i64, tpu.core_type = #tpu.core_type<tc>, window_params = [{transform_indices = @transform_0, window_bounds = array<i64: 16, 16>}, {pipeline_mode = #tpu.pipeline_mode<synchronous>, transform_indices = @transform_1, window_bounds = array<i64: 16, 128>}, {pipeline_mode = #tpu.pipeline_mode<synchronous>, transform_indices = @transform_2, window_bounds = array<i64: 1, 128>}, {pipeline_mode = #tpu.pipeline_mode<synchronous>, transform_indices = @transform_3, window_bounds = array<i64: 128, 128>}, {pipeline_mode = #tpu.pipeline_mode<synchronous>, transform_indices = @transform_4, window_bounds = array<i64: 1, 128>}, {pipeline_mode = #tpu.pipeline_mode<synchronous>, transform_indices = @transform_5, window_bounds = array<i64: 128, 128>}, {pipeline_mode = #tpu.pipeline_mode<synchronous>, transform_indices = @transform_6, window_bounds = array<i64: 1, 128>}, {pipeline_mode = #tpu.pipeline_mode<synchronous>, transform_indices = @transform_7, window_bounds = array<i64: 128, 128>}, {pipeline_mode = #tpu.pipeline_mode<synchronous>, transform_indices = @transform_8, window_bounds = array<i64: 1, 128>}, {transform_indices = @transform_9, window_bounds = array<i64: 16, 128>}]} {
    %c0 = arith.constant 0 : index
    %c0_0 = arith.constant 0 : index
    %0 = vector.load %arg1[%c0, %c0_0] : memref<16x16xf32, #tpu.memory_space<vmem>>, vector<16x16xf32>
    %1 = arith.truncf %0 : vector<16x16xf32> to vector<16x16xbf16>
    %c0_1 = arith.constant 0 : index
    %c0_2 = arith.constant 0 : index
    %2 = vector.load %arg2[%c0_1, %c0_2] : memref<16x128xbf16, #tpu.memory_space<vmem>>, vector<16x128xbf16>
    %cst = arith.constant dense<0.000000e+00> : vector<16x128xf32>
    %3 = tpu.matmul %1, %2, %cst {dimension_numbers = #tpu.dot_dimension_numbers<[1], [0], [0], [1], [0, 0, 1, 1], [], []>} : vector<16x16xbf16>, vector<16x128xbf16>, vector<16x128xf32> -> vector<16x128xf32>
    %c0_3 = arith.constant 0 : index
    %c0_4 = arith.constant 0 : index
    %4 = vector.load %arg3[%c0_3, %c0_4] : memref<1x128xf32, #tpu.memory_space<vmem>>, vector<1x128xf32>
    %5 = vector.broadcast %4 : vector<1x128xf32> to vector<16x128xf32>
    %6 = arith.addf %3, %5 : vector<16x128xf32>
    %cst_5 = arith.constant 0.00999999977 : f32
    %7 = vector.broadcast %cst_5 : f32 to vector<16x128xf32>
    %8 = arith.mulf %7, %6 : vector<16x128xf32>
    %9 = arith.maximumf %6, %8 : vector<16x128xf32>
    %10 = arith.truncf %9 : vector<16x128xf32> to vector<16x128xbf16>
    %c0_6 = arith.constant 0 : index
    %c0_7 = arith.constant 0 : index
    %11 = vector.load %arg4[%c0_6, %c0_7] : memref<128x128xbf16, #tpu.memory_space<vmem>>, vector<128x128xbf16>
    %cst_8 = arith.constant dense<0.000000e+00> : vector<16x128xf32>
    %12 = tpu.matmul %10, %11, %cst_8 {dimension_numbers = #tpu.dot_dimension_numbers<[1], [0], [0], [1], [0, 0, 1, 1], [], []>} : vector<16x128xbf16>, vector<128x128xbf16>, vector<16x128xf32> -> vector<16x128xf32>
    %c0_9 = arith.constant 0 : index
    %c0_10 = arith.constant 0 : index
    %13 = vector.load %arg5[%c0_9, %c0_10] : memref<1x128xf32, #tpu.memory_space<vmem>>, vector<1x128xf32>
    %14 = vector.broadcast %13 : vector<1x128xf32> to vector<16x128xf32>
    %15 = arith.addf %12, %14 : vector<16x128xf32>
    %cst_11 = arith.constant 0.00999999977 : f32
    %16 = vector.broadcast %cst_11 : f32 to vector<16x128xf32>
    %17 = arith.mulf %16, %15 : vector<16x128xf32>
    %18 = arith.maximumf %15, %17 : vector<16x128xf32>
    %19 = arith.truncf %18 : vector<16x128xf32> to vector<16x128xbf16>
    %c0_12 = arith.constant 0 : index
    %c0_13 = arith.constant 0 : index
    %20 = vector.load %arg6[%c0_12, %c0_13] : memref<128x128xbf16, #tpu.memory_space<vmem>>, vector<128x128xbf16>
    %cst_14 = arith.constant dense<0.000000e+00> : vector<16x128xf32>
    %21 = tpu.matmul %19, %20, %cst_14 {dimension_numbers = #tpu.dot_dimension_numbers<[1], [0], [0], [1], [0, 0, 1, 1], [], []>} : vector<16x128xbf16>, vector<128x128xbf16>, vector<16x128xf32> -> vector<16x128xf32>
    %c0_15 = arith.constant 0 : index
    %c0_16 = arith.constant 0 : index
    %22 = vector.load %arg7[%c0_15, %c0_16] : memref<1x128xf32, #tpu.memory_space<vmem>>, vector<1x128xf32>
    %23 = vector.broadcast %22 : vector<1x128xf32> to vector<16x128xf32>
    %24 = arith.addf %21, %23 : vector<16x128xf32>
    %cst_17 = arith.constant 0.00999999977 : f32
    %25 = vector.broadcast %cst_17 : f32 to vector<16x128xf32>
    %26 = arith.mulf %25, %24 : vector<16x128xf32>
    %27 = arith.maximumf %24, %26 : vector<16x128xf32>
    %28 = arith.truncf %27 : vector<16x128xf32> to vector<16x128xbf16>
    %c0_18 = arith.constant 0 : index
    %c0_19 = arith.constant 0 : index
    %29 = vector.load %arg8[%c0_18, %c0_19] : memref<128x128xbf16, #tpu.memory_space<vmem>>, vector<128x128xbf16>
    %cst_20 = arith.constant dense<0.000000e+00> : vector<16x128xf32>
    %30 = tpu.matmul %28, %29, %cst_20 {dimension_numbers = #tpu.dot_dimension_numbers<[1], [0], [0], [1], [0, 0, 1, 1], [], []>} : vector<16x128xbf16>, vector<128x128xbf16>, vector<16x128xf32> -> vector<16x128xf32>
    %c0_21 = arith.constant 0 : index
    %c0_22 = arith.constant 0 : index
    %31 = vector.load %arg9[%c0_21, %c0_22] : memref<1x128xf32, #tpu.memory_space<vmem>>, vector<1x128xf32>
    %32 = vector.broadcast %31 : vector<1x128xf32> to vector<16x128xf32>
    %33 = arith.addf %30, %32 : vector<16x128xf32>
    %34 = math.tanh %33 : vector<16x128xf32>
    %35 = arith.truncf %34 : vector<16x128xf32> to vector<16x128xbf16>
    %c0_23 = arith.constant 0 : index
    %c0_24 = arith.constant 0 : index
    %36 = vector.load %arg10[%c0_23, %c0_24] : memref<16x128xbf16, #tpu.memory_space<vmem>>, vector<16x128xbf16>
    tpu.vector_store %arg10[%c0_23, %c0_24], %35 {strides = array<i32>} : memref<16x128xbf16, #tpu.memory_space<vmem>>, vector<16x128xbf16>,
    return
  }
  func.func @transform_0(%arg0: i32) -> (i32, i32) {
    %c0_i32 = arith.constant 0 : i32
    %c0_i32_0 = arith.constant 0 : i32
    return %arg0, %c0_i32 : i32, i32
  }
  func.func @transform_1(%arg0: i32) -> (i32, i32) {
    %c0_i32 = arith.constant 0 : i32
    %c0_i32_0 = arith.constant 0 : i32
    %c0_i32_1 = arith.constant 0 : i32
    return %c0_i32, %c0_i32_0 : i32, i32
  }
  func.func @transform_2(%arg0: i32) -> (i32, i32) {
    %c0_i32 = arith.constant 0 : i32
    %c0_i32_0 = arith.constant 0 : i32
    %c0_i32_1 = arith.constant 0 : i32
    return %c0_i32, %c0_i32_0 : i32, i32
  }
  func.func @transform_3(%arg0: i32) -> (i32, i32) {
    %c0_i32 = arith.constant 0 : i32
    %c0_i32_0 = arith.constant 0 : i32
    %c0_i32_1 = arith.constant 0 : i32
    return %c0_i32, %c0_i32_0 : i32, i32
  }
  func.func @transform_4(%arg0: i32) -> (i32, i32) {
    %c0_i32 = arith.constant 0 : i32
    %c0_i32_0 = arith.constant 0 : i32
    %c0_i32_1 = arith.constant 0 : i32
    return %c0_i32, %c0_i32_0 : i32, i32
  }
  func.func @transform_5(%arg0: i32) -> (i32, i32) {
    %c0_i32 = arith.constant 0 : i32
    %c0_i32_0 = arith.constant 0 : i32
    %c0_i32_1 = arith.constant 0 : i32
    return %c0_i32, %c0_i32_0 : i32, i32
  }
  func.func @transform_6(%arg0: i32) -> (i32, i32) {
    %c0_i32 = arith.constant 0 : i32
    %c0_i32_0 = arith.constant 0 : i32
    %c0_i32_1 = arith.constant 0 : i32
    return %c0_i32, %c0_i32_0 : i32, i32
  }
  func.func @transform_7(%arg0: i32) -> (i32, i32) {
    %c0_i32 = arith.constant 0 : i32
    %c0_i32_0 = arith.constant 0 : i32
    %c0_i32_1 = arith.constant 0 : i32
    return %c0_i32, %c0_i32_0 : i32, i32
  }
  func.func @transform_8(%arg0: i32) -> (i32, i32) {
    %c0_i32 = arith.constant 0 : i32
    %c0_i32_0 = arith.constant 0 : i32
    %c0_i32_1 = arith.constant 0 : i32
    return %c0_i32, %c0_i32_0 : i32, i32
  }
  func.func @transform_9(%arg0: i32) -> (i32, i32) {
    %c0_i32 = arith.constant 0 : i32
    %c0_i32_0 = arith.constant 0 : i32
    return %arg0, %c0_i32 : i32, i32
  }
}

</mosaic_0001>

<bundles_post_ra>
// kernel: tpu_custom_call.1
= control target key start
LH: loop header
LB: loop body
LE: loop exit
PB: predicated region body
PF: predicated region fallthrough
CT: control target
= control target key end

     0   :  { %14 = vsyncpa [#allocation3], 0  ;;  %s1056_s0 = inlined_call_operand.hbm [shape: f32[16,16], index: 0, kind: input, shape index: {}]   ;;  %s1057_s1 = inlined_call_operand.hbm [shape: bf16[16,128], index: 1, kind: input, shape index: {}]   ;;  %s1058_s2 = inlined_call_operand.vmem [shape: f32[1,128], index: 2, kind: input, shape index: {}]   ;;  %s1059_s3 = inlined_call_operand.hbm [shape: bf16[128,128], index: 3, kind: input, shape index: {}]   ;;  %s1060_s4 = inlined_call_operand.vmem [shape: f32[1,128], index: 4, kind: input, shape index: {}]   ;;  %s1061_s5 = inlined_call_operand.hbm [shape: bf16[128,128], index: 5, kind: input, shape index: {}]   ;;  %s1062_s6 = inlined_call_operand.vmem [shape: f32[1,128], index: 6, kind: input, shape index: {}]   ;;  %s1063_s7 = inlined_call_operand.hbm [shape: bf16[128,128], index: 7, kind: input, shape index: {}]   ;;  %s1064_s8 = inlined_call_operand.vmem [shape: f32[1,128], index: 8, kind: input, shape index: {}]   ;;  %s1065_s9 = inlined_call_operand.hbm [shape: bf16[16,128], index: 9, kind: output, shape index: {}]  }
   0x1   :  { %15 = vsyncpa [#allocation6], 0 }
   0x2   :  { %16 = vsyncpa [#allocation9], 0 }
   0x3   :  { %17 = vsyncpa [#allocation4], 0  ;;  %s862_s30 = smov [#allocation5]   ;;  %s722_s13 = scalar_lea.hbm %s1057_s1, 128 }
   0x4   :  { %s35_s10 = sshll.u32 %s862_s30, 4  ;;  %p723_p0 = scmp.ne.s32.totalorder %s1057_s1, %s722_s13  ;;  %s36_s10 = int_to_ptr.vmem [resolvable:$true] %s35_s10 }
   0x5   :  { %p726_p1 = scmp.lt.u32.totalorder %s722_s13, %s1057_s1 }
   0x7   :  { %p728_p2 = pnand %p726_p1, %p723_p0 }
   0x9   :  { %731 = shalt.err (!%p728_p2)
}
   0xa   :  { %s732_s18 = scalar_lea.vmem %s36_s10, 128  ;;  %p737_p4 = scmp.lt.s32.totalorder %s36_s10, %s36_s10 }
   0xb   :  { %p733_p3 = scmp.ne.s32.totalorder %s36_s10, %s732_s18  ;;  %p738_p5 = scmp.lt.s32.totalorder %s732_s18, %s732_s18 }
   0xd   :  { %p739_p6 = por %p738_p5, %p737_p4 }
   0xf   :  { %p740_p7 = pnand %p739_p6, %p733_p3 }
  0x11   :  { %743 = shalt.err (!%p740_p7)
}
  0x12   :  { %s863_s19 = smov 64   ;;  %s864_s20 = smov 4  }
  0x13   :  { %41 = dma.hbm_to_vmem [thread:$0]  %s1057_s1, 128, %s36_s10, [#allocation6], %s863_s19, %s863_s19, %s864_s20  }
  0x14   :  { %s865_s23 = smov [#allocation8]   ;;  %s866_s25 = smov [#allocation2]  }
  0x15   :  { %s63_s24 = sshll.u32 %s865_s23, 4  ;;  %s23_s26 = sshll.u32 %s866_s25, 4  ;;  %s64_s24 = int_to_ptr.vmem [resolvable:$true] %s63_s24  ;;  %s24_s26 = int_to_ptr.vmem [resolvable:$true] %s23_s26 }
  0x16   :  { %s744_s29 = scalar_lea.hbm %s1061_s5, 1024 }
  0x17   :  { %p745_p8 = scmp.ne.s32.totalorder %s1061_s5, %s744_s29  ;;  %p748_p9 = scmp.lt.u32.totalorder %s744_s29, %s1061_s5 }
  0x19   :  { %p750_p10 = pnand %p748_p9, %p745_p8 }
  0x1b   :  { %753 = shalt.err (!%p750_p10)
}
  0x1c   :  { %s754_s1 = scalar_lea.vmem %s64_s24, 1024  ;;  %p759_p12 = scmp.lt.s32.totalorder %s64_s24, %s64_s24 }
  0x1d   :  { %p755_p11 = scmp.ne.s32.totalorder %s64_s24, %s754_s1  ;;  %p760_p13 = scmp.lt.s32.totalorder %s754_s1, %s754_s1 }
  0x1f   :  { %p761_p0 = por %p760_p13, %p759_p12 }
  0x21   :  { %p762_p1 = pnand %p761_p0, %p755_p11 }
  0x23   :  { %765 = shalt.err (!%p762_p1)
}
  0x24   :  { %69 = dma.hbm_to_vmem [thread:$0]  %s1061_s5, 1024, %s64_s24, [#allocation9], %s863_s19, %s863_s19, %s864_s20  }
  0x25   :  { %s766_s17 = scalar_lea.hbm %s1056_s0, 256 }
  0x26   :  { %p767_p2 = scmp.ne.s32.totalorder %s1056_s0, %s766_s17  ;;  %p770_p3 = scmp.lt.u32.totalorder %s766_s17, %s1056_s0 }
  0x28   :  { %p772_p4 = pnand %p770_p3, %p767_p2 }
  0x2a   :  { %775 = shalt.err (!%p772_p4)
}
  0x2b   :  { %s776_s25 = scalar_lea.vmem %s24_s26, 256  ;;  %p781_p6 = scmp.lt.s32.totalorder %s24_s26, %s24_s26 }
  0x2c   :  { %p777_p5 = scmp.ne.s32.totalorder %s24_s26, %s776_s25  ;;  %p782_p7 = scmp.lt.s32.totalorder %s776_s25, %s776_s25 }
  0x2e   :  { %p783_p8 = por %p782_p7, %p781_p6 }
  0x30   :  { %p784_p9 = pnand %p783_p8, %p777_p5 }
  0x32   :  { %787 = shalt.err (!%p784_p9)
}
  0x33   :  { %s867_s5 = smov 128   ;;  %s868_s24 = smov 8  }
  0x34   :  { %29 = dma.hbm_to_vmem [thread:$0]  %s1056_s0, 256, %s24_s26, [#allocation3], %s867_s5, %s867_s5, %s868_s24  }
  0x35   :  { %s869_s29 = smov [#allocation7]   ;;  %s870_s11 = smov [#allocation10]  }
  0x36   :  { %s49_s30 = sshll.u32 %s869_s29, 4  ;;  %s77_s12 = sshll.u32 %s870_s11, 4  ;;  %s50_s30 = int_to_ptr.vmem [resolvable:$true] %s49_s30  ;;  %s78_s12 = int_to_ptr.vmem [resolvable:$true] %s77_s12 }
  0x37   :  { %s788_s10 = scalar_lea.hbm %s1059_s3, 1024 }
  0x38   :  { %p789_p10 = scmp.ne.s32.totalorder %s1059_s3, %s788_s10  ;;  %p792_p11 = scmp.lt.u32.totalorder %s788_s10, %s1059_s3 }
  0x3a   :  { %p794_p12 = pnand %p792_p11, %p789_p10 }
  0x3c   :  { %797 = shalt.err (!%p794_p12)
}
  0x3d   :  { %s798_s0 = scalar_lea.vmem %s50_s30, 1024  ;;  %p803_p0 = scmp.lt.s32.totalorder %s50_s30, %s50_s30 }
  0x3e   :  { %p799_p13 = scmp.ne.s32.totalorder %s50_s30, %s798_s0  ;;  %p804_p1 = scmp.lt.s32.totalorder %s798_s0, %s798_s0 }
  0x40   :  { %p805_p2 = por %p804_p1, %p803_p0 }
  0x42   :  { %p806_p3 = pnand %p805_p2, %p799_p13 }
  0x44   :  { %809 = shalt.err (!%p806_p3)
}
  0x45   :  { %55 = dma.hbm_to_vmem [thread:$0]  %s1059_s3, 1024, %s50_s30, [#allocation6], %s863_s19, %s863_s19, %s864_s20  }
  0x46   :  { %s810_s23 = scalar_lea.hbm %s1063_s7, 1024 }
  0x47   :  { %p811_p4 = scmp.ne.s32.totalorder %s1063_s7, %s810_s23  ;;  %p814_p5 = scmp.lt.u32.totalorder %s810_s23, %s1063_s7 }
  0x49   :  { %p816_p6 = pnand %p814_p5, %p811_p4 }
  0x4b   :  { %819 = shalt.err (!%p816_p6)
}
  0x4c   :  { %s820_s28 = scalar_lea.vmem %s78_s12, 1024  ;;  %p825_p8 = scmp.lt.s32.totalorder %s78_s12, %s78_s12 }
  0x4d   :  { %p821_p7 = scmp.ne.s32.totalorder %s78_s12, %s820_s28  ;;  %p826_p9 = scmp.lt.s32.totalorder %s820_s28, %s820_s28 }
  0x4f   :  { %p827_p10 = por %p826_p9, %p825_p8 }
  0x51   :  { %p828_p11 = pnand %p827_p10, %p821_p7 }
  0x53   :  { %831 = shalt.err (!%p828_p11)
}
  0x54   :  { %83 = dma.hbm_to_vmem [thread:$0]  %s1063_s7, 1024, %s78_s12, [#allocation9], %s863_s19, %s863_s19, %s864_s20  }
  0x55   :  { %854 = dma.done.wait [#allocation3], 256  }
  0x56   :  { %855 = vsyncadd [#allocation3], 4294967040 }
  0x57   :  { %856 = dma.done.wait [#allocation6], 1152  }
  0x58   :  { %857 = vsyncadd [#allocation6], 4294966144 }
  0x59   :  { %858 = dma.done.wait [#allocation9], 2048  }
  0x5a   :  { %859 = vsyncadd [#allocation9], 4294965248  ;;  %v871_v0 = vmov 0.0   ;;  %vm872_vm0 = vmmov 0   ;;  %v693_v1 = vld [vmem:[#allocation5] sm:$0xff]   ;;  %v102_v2 = vld [vmem:[#allocation2] sm:$0xff] }
  0x5b   :  { %615 = vmatprep.subr.bf16.mxu0 %v871_v0  ;;  %617 = vmatprep.mubr.msk.bf16.mxu0 %vm872_vm0, %v871_v0  ;;  %v103_v3 = vld [vmem:[#allocation2 + $0x8] sm:$0xff]  ;;  %vm120_vm1 = vcmask 130048   ;;  %v694_v5 = vld [vmem:[#allocation7] sm:$0xff]   ;;  %v695_v6 = vld [vmem:[#allocation7 + $0x8] sm:$0xff]  }
  0x5c   :  { %621 = vmatprep.subr.bf16.mxu1 %v871_v0  ;;  %637 = vmatprep.mubr.msk.bf16.mxu1 %vm872_vm0, %v871_v0  ;;  %v104_v4 = vpack.c.bf16 %v103_v3, %v102_v2  ;;  %v696_v7 = vld [vmem:[#allocation7 + $0x10] sm:$0xff]   ;;  %v697_v8 = vld [vmem:[#allocation7 + $0x18] sm:$0xff]   ;;  %v698_v9 = vld [vmem:[#allocation7 + $0x20] sm:$0xff]  }
  0x5d   :  { %616 = vmatpush3.bf16.msra.mxu0 %v693_v1  ;;  %622 = vmatpush3.bf16.msra.mxu1 %v694_v5  ;;  %v699_v10 = vld [vmem:[#allocation7 + $0x28] sm:$0xff]   ;;  %v700_v11 = vld [vmem:[#allocation7 + $0x30] sm:$0xff]   ;;  %v701_v12 = vld [vmem:[#allocation7 + $0x38] sm:$0xff]  }
  0x5e   :  { %641 = vmatprep.subr.bf16.mxu0 %v871_v0  ;;  %623 = vmatprep.subr.bf16.mxu1 %v871_v0  ;;  %v702_v13 = vld [vmem:[#allocation8] sm:$0xff]   ;;  %v703_v14 = vld [vmem:[#allocation8 + $0x8] sm:$0xff]   ;;  %v704_v15 = vld [vmem:[#allocation8 + $0x10] sm:$0xff]  }
  0x5f   :  { %v705_v16 = vld [vmem:[#allocation8 + $0x18] sm:$0xff]   ;;  %v706_v17 = vld [vmem:[#allocation8 + $0x20] sm:$0xff]   ;;  %v547_v18 = vld [vmem:[%s1058_s2] ss:$0 sm:$0xff] }
  0x60   :  { %618 = vmatmul.mubr.msk.bf16.vlgmr.msra.gmra.mrb[0].mxu0 %vm120_vm1, %v104_v4  ;;  %v707_v30 = vld [vmem:[#allocation8 + $0x28] sm:$0xff]   ;;  %v708_v31 = vld [vmem:[#allocation8 + $0x30] sm:$0xff]   ;;  %v709_v32 = vld [vmem:[#allocation8 + $0x38] sm:$0xff]  }
  0x61   :  { %657 = vmatprep.mubr.msk.bf16.mxu0 %vm872_vm0, %v871_v0  ;;  %624 = vmatpush3.bf16.msra.mxu1 %v695_v6  ;;  %v710_v33 = vld [vmem:[#allocation10] sm:$0xff]   ;;  %v711_v34 = vld [vmem:[#allocation10 + $0x8] sm:$0xff]   ;;  %v712_v35 = vld [vmem:[#allocation10 + $0x10] sm:$0xff]  }
  0x62   :  { %625 = vmatprep.subr.bf16.mxu1 %v871_v0  ;;  %642 = vmatpush3.bf16.msra.mxu0 %v702_v13  ;;  %v713_v36 = vld [vmem:[#allocation10 + $0x18] sm:$0xff]   ;;  %v714_v37 = vld [vmem:[#allocation10 + $0x20] sm:$0xff]   ;;  %v550_v38 = vld [vmem:[%s1060_s4] ss:$0 sm:$0xff] }
  0x63   :  { %643 = vmatprep.subr.bf16.mxu0 %v871_v0  ;;  %v715_v50 = vld [vmem:[#allocation10 + $0x28] sm:$0xff]   ;;  %v716_v51 = vld [vmem:[#allocation10 + $0x30] sm:$0xff]   ;;  %v717_v52 = vld [vmem:[#allocation10 + $0x38] sm:$0xff]  }
  0x64   :  { %v559_v53 = vld [vmem:[%s1062_s6] ss:$0 sm:$0xff]  ;;  %s873_s6 = smov [#allocation11]  }
  0x65   :  { %626 = vmatpush3.bf16.msra.mxu1 %v696_v7  ;;  %s533_s10 = sshll.u32 %s873_s6, 4  ;;  %s534_s10 = int_to_ptr.vmem [resolvable:$true] %s533_s10 }
  0x66   :  { %627 = vmatprep.subr.bf16.mxu1 %v871_v0  ;;  %644 = vmatpush3.bf16.msra.mxu0 %v703_v14  ;;  %s832_s14 = scalar_lea.vmem %s534_s10, 128  ;;  %p837_p13 = scmp.lt.s32.totalorder %s534_s10, %s534_s10 }
  0x67   :  { %645 = vmatprep.subr.bf16.mxu0 %v871_v0  ;;  %p833_p12 = scmp.ne.s32.totalorder %s534_s10, %s832_s14  ;;  %p838_p0 = scmp.lt.s32.totalorder %s832_s14, %s832_s14 }
  0x69   :  { %628 = vmatpush3.bf16.msra.mxu1 %v697_v8  ;;  %p839_p1 = por %p838_p0, %p837_p13 }
  0x6a   :  { %629 = vmatprep.subr.bf16.mxu1 %v871_v0  ;;  %646 = vmatpush3.bf16.msra.mxu0 %v704_v15 }
  0x6b   :  { %647 = vmatprep.subr.bf16.mxu0 %v871_v0  ;;  %p840_p2 = pnand %p839_p1, %p833_p12 }
  0x6d   :  { %630 = vmatpush3.bf16.msra.mxu1 %v698_v9 }
  0x6e   :  { %631 = vmatprep.subr.bf16.mxu1 %v871_v0  ;;  %648 = vmatpush3.bf16.msra.mxu0 %v705_v16 }
  0x6f   :  { %649 = vmatprep.subr.bf16.mxu0 %v871_v0 }
  0x71   :  { %632 = vmatpush3.bf16.msra.mxu1 %v699_v10 }
  0x72   :  { %633 = vmatprep.subr.bf16.mxu1 %v871_v0  ;;  %650 = vmatpush3.bf16.msra.mxu0 %v706_v17 }
  0x73   :  { %651 = vmatprep.subr.bf16.mxu0 %v871_v0 }
  0x75   :  { %634 = vmatpush3.bf16.msra.mxu1 %v700_v11 }
  0x76   :  { %635 = vmatprep.subr.bf16.mxu1 %v871_v0  ;;  %652 = vmatpush3.bf16.msra.mxu0 %v707_v30 }
  0x77   :  { %653 = vmatprep.subr.bf16.mxu0 %v871_v0 }
  0x79   :  { %636 = vmatpush3.bf16.msra.mxu1 %v701_v12 }
  0x7a   :  { %661 = vmatprep.subr.bf16.mxu1 %v871_v0  ;;  %654 = vmatpush3.bf16.msra.mxu0 %v708_v31 }
  0x7b   :  { %655 = vmatprep.subr.bf16.mxu0 %v871_v0 }
  0x7e   :  { %656 = vmatpush3.bf16.msra.mxu0 %v709_v32 }
 0x133   :  { %v158_v19 = vpop.f32.mrb[0].mxu0 }
 0x134   :  { %v159_v20 = vadd.f32 %v547_v18, %v158_v19  ;;  %v619_v21 = vpop.f32.mrb[1].mxu0 }
 0x135   :  { %v161_v22 = vpop.f32.mrb[2].mxu0 }
 0x136   :  { %v165_v23 = vmul.f32 0.01, %v159_v20  ;;  %v162_v24 = vadd.f32 %v547_v18, %v161_v22  ;;  %v620_v25 = vpop.f32.mrb[3].mxu0 }
 0x138   :  { %v166_v26 = vmul.f32 0.01, %v162_v24  ;;  %v167_v27 = vmax.f32 %v159_v20, %v165_v23 }
 0x13a   :  { %v168_v28 = vmax.f32 %v162_v24, %v166_v26 }
 0x13c   :  { %v169_v29 = vpack.c.bf16 %v168_v28, %v167_v27 }
 0x13e   :  { %638 = vmatmul.mubr.bf16.vlgmr.msra.gmra.mrb[0].mxu1 %v169_v29 }
 0x13f   :  { %677 = vmatprep.mubr.msk.bf16.mxu1 %vm872_vm0, %v871_v0  ;;  %662 = vmatpush3.bf16.msra.mxu1 %v710_v33 }
 0x140   :  { %663 = vmatprep.subr.bf16.mxu1 %v871_v0 }
 0x143   :  { %664 = vmatpush3.bf16.msra.mxu1 %v711_v34 }
 0x144   :  { %665 = vmatprep.subr.bf16.mxu1 %v871_v0 }
 0x147   :  { %666 = vmatpush3.bf16.msra.mxu1 %v712_v35 }
 0x148   :  { %667 = vmatprep.subr.bf16.mxu1 %v871_v0 }
 0x14b   :  { %668 = vmatpush3.bf16.msra.mxu1 %v713_v36 }
 0x14c   :  { %669 = vmatprep.subr.bf16.mxu1 %v871_v0 }
 0x14f   :  { %670 = vmatpush3.bf16.msra.mxu1 %v714_v37 }
 0x150   :  { %671 = vmatprep.subr.bf16.mxu1 %v871_v0 }
 0x153   :  { %672 = vmatpush3.bf16.msra.mxu1 %v715_v50 }
 0x154   :  { %673 = vmatprep.subr.bf16.mxu1 %v871_v0 }
 0x157   :  { %674 = vmatpush3.bf16.msra.mxu1 %v716_v51 }
 0x158   :  { %675 = vmatprep.subr.bf16.mxu1 %v871_v0  ;;  %v568_v0 = vld [vmem:[%s1064_s8] ss:$0 sm:$0xff] }
 0x15b   :  { %676 = vmatpush3.bf16.msra.mxu1 %v717_v52 }
 0x211   :  { %v275_v39 = vpop.f32.mrb[0].mxu1 }
 0x212   :  { %v276_v40 = vadd.f32 %v550_v38, %v275_v39  ;;  %v639_v41 = vpop.f32.mrb[1].mxu1 }
 0x213   :  { %v278_v42 = vpop.f32.mrb[2].mxu1 }
 0x214   :  { %v282_v43 = vmul.f32 0.01, %v276_v40  ;;  %v279_v44 = vadd.f32 %v550_v38, %v278_v42  ;;  %v640_v45 = vpop.f32.mrb[3].mxu1 }
 0x216   :  { %v283_v46 = vmul.f32 0.01, %v279_v44  ;;  %v284_v47 = vmax.f32 %v276_v40, %v282_v43 }
 0x218   :  { %v285_v48 = vmax.f32 %v279_v44, %v283_v46 }
 0x21a   :  { %v286_v49 = vpack.c.bf16 %v285_v48, %v284_v47 }
 0x21c   :  { %658 = vmatmul.mubr.bf16.vlgmr.msra.gmra.mrb[4].mxu0 %v286_v49 }
 0x2ef   :  { %v392_v54 = vpop.f32.mrb[4].mxu0 }
 0x2f0   :  { %v393_v55 = vadd.f32 %v559_v53, %v392_v54  ;;  %v659_v56 = vpop.f32.mrb[5].mxu0 }
 0x2f1   :  { %v395_v57 = vpop.f32.mrb[6].mxu0 }
 0x2f2   :  { %v399_v58 = vmul.f32 0.01, %v393_v55  ;;  %v396_v59 = vadd.f32 %v559_v53, %v395_v57  ;;  %v660_v60 = vpop.f32.mrb[7].mxu0 }
 0x2f4   :  { %v400_v61 = vmul.f32 0.01, %v396_v59  ;;  %v401_v62 = vmax.f32 %v393_v55, %v399_v58 }
 0x2f6   :  { %v402_v63 = vmax.f32 %v396_v59, %v400_v61 }
 0x2f8   :  { %v403_v1 = vpack.c.bf16 %v402_v63, %v401_v62 }
 0x2fa   :  { %678 = vmatmul.mubr.bf16.vlgmr.msra.gmra.mrb[4].mxu1 %v403_v1 }
 0x3cd   :  { %v509_v2 = vpop.f32.mrb[4].mxu1 }
 0x3ce   :  { %v510_v3 = vadd.f32 %v568_v0, %v509_v2  ;;  %v679_v4 = vpop.f32.mrb[5].mxu1 }
 0x3cf   :  { %v512_v5 = vpop.f32.mrb[6].mxu1 }
 0x3d0   :  { %v513_v6 = vadd.f32 %v568_v0, %v512_v5  ;;  %v680_v7 = vpop.f32.mrb[7].mxu1  ;;  %718 = vtanh.f32 %v510_v3 }
 0x3d2   :  { %720 = vtanh.f32 %v513_v6 }
 0x3da   :  { %v719_v8 = vpop.eup %718 }
 0x3dc   :  { %v721_v9 = vpop.eup %720 }
 0x3dd   :  { %v584_v10 = vpack.c.bf16 %v721_v9, %v719_v8 }
 0x3df   :  { %585 = vst [vmem:[#allocation11] sm:$0xff] %v584_v10  }
 0x3e0   :  { %843 = shalt.err (!%p840_p2)
}
 0x3e1   :  { %s844_s16 = scalar_lea.hbm %s1065_s9, 128 }
 0x3e2   :  { %p845_p3 = scmp.ne.s32.totalorder %s1065_s9, %s844_s16  ;;  %p848_p4 = scmp.lt.u32.totalorder %s844_s16, %s1065_s9 }
 0x3e4   :  { %p850_p5 = pnand %p848_p4, %p845_p3 }
 0x3e6   :  { %853 = shalt.err (!%p850_p5)
}
 0x3e7   :  { %539 = dma.vmem_to_hbm [thread:$0]  %s534_s10, 128, %s1065_s9, [#allocation4], %s863_s19, %s863_s19, %s864_s20  }
 0x3e8   :  { %860 = dma.done.wait [#allocation4], 128  }
 0x3e9   :  { %861 = vsyncadd [#allocation4], 4294967168 }
 0x3ea   :  { %543 = vsyncpa [#allocation3], 1 }
 0x3eb   :  { %544 = vsyncpa [#allocation6], 1 }
 0x3ec   :  { %545 = vsyncpa [#allocation9], 1 }
 0x3ed   :  { %546 = vsyncpa [#allocation4], 1 }

</bundles_post_ra>
